<compile_context>
chip_gen: v7x
topology: tpu7x:2x2x1
jax: 0.10.0
libtpu: 0.0.40
codegen_flags: <defaults>
</compile_context>

<pallas_src>
import functools

import jax
import jax.numpy as jnp
import numpy as np
from jax.experimental import pallas as pl
from jax.experimental.pallas import tpu as pltpu

SELU_ALPHA = 1.6732632423543772
SELU_SCALE = 1.0507009873554805
LN_EPS = 1e-5
T_CAP = 4096  # max time tile (multiple of 128); transposed-layout footprint is tiny


# ---------------------------------------------------------------------------
# In-kernel transposed MLP: chained [LayerNorm] -> Linear -> [SELU].
# y has shape (features, cols): features on sublanes, time/cols on lanes.
# Per layer params: W_T (d_out, d_in), b (d_out, 1) [+ gamma/beta (d_in, 1)].
# ---------------------------------------------------------------------------
def _mlp_transposed(y, param_refs, flags):
    idx = 0
    for use_ln, use_selu in flags:
        w_ref, b_ref = param_refs[idx], param_refs[idx + 1]
        idx += 2
        if use_ln:
            g_ref, be_ref = param_refs[idx], param_refs[idx + 1]
            idx += 2
            mu = jnp.mean(y, axis=0, keepdims=True)
            var = jnp.mean((y - mu) ** 2, axis=0, keepdims=True)
            y = (y - mu) * jax.lax.rsqrt(var + LN_EPS)
            y = y * g_ref[...] + be_ref[...]
        y = jnp.dot(w_ref[...], y, preferred_element_type=jnp.float32) + b_ref[...]
        if use_selu:
            y = SELU_SCALE * jnp.where(
                y > 0.0, y, SELU_ALPHA * (jnp.exp(jnp.minimum(y, 0.0)) - 1.0))
    return y


def _fused_kernel_with_rhs(x_ref, xrhs_ref, ym_ref, *refs,
                           left_flags, right_flags, n_left, n_right):
    left_refs = refs[:n_left]
    right_refs = refs[n_left:n_left + n_right]
    out_ref = refs[n_left + n_right]
    rhs_ref = refs[n_left + n_right + 1]
    scale_scr = refs[n_left + n_right + 2]

    # Right MLP + per-batch combine scale: once per batch (first time tile).
    @pl.when(pl.program_id(1) == 0)
    def _():
        r = _mlp_transposed(xrhs_ref[...].astype(jnp.float32),
                            right_refs, right_flags)          # (F, 1)
        rhs_ref[...] = r.astype(rhs_ref.dtype)                 # module's `rhs` output
        scale_scr[...] = r * ym_ref[...].astype(jnp.float32)   # rhs * y_macro

    # Left MLP on this (n_alphas, T_TILE) tile, then factor-dim reduction.
    y = _mlp_transposed(x_ref[...].astype(jnp.float32),
                        left_refs, left_flags)                 # (F, t_tile)
    out_ref[...] = jnp.sum(y * scale_scr[...], axis=0,
                           keepdims=True).astype(out_ref.dtype)


def _fused_kernel_given_scale(x_ref, scale_ref, *refs, left_flags, n_left):
    left_refs = refs[:n_left]
    out_ref = refs[n_left]
    y = _mlp_transposed(x_ref[...].astype(jnp.float32), left_refs, left_flags)
    out_ref[...] = jnp.sum(y * scale_ref[...].astype(jnp.float32),
                           axis=0, keepdims=True).astype(out_ref.dtype)


def _param_inputs_and_specs(layers):
    """Tiny weights: full-extent blocks, constant index maps -> VMEM-resident."""
    inputs, specs = [], []
    for lyr in layers:
        tensors = [lyr["WT"], lyr["b"]]
        if lyr["use_ln"]:
            tensors += [lyr["gamma"], lyr["beta"]]
        for p in tensors:
            inputs.append(p)
            specs.append(pl.BlockSpec(p.shape, lambda b, t: (0, 0)))
    return inputs, specs


def _flags(layers):
    return tuple((bool(l["use_ln"]), bool(l["use_selu"])) for l in layers)


def _time_tiling(T, t_cap):
    assert t_cap % 128 == 0
    t_tile = T if T <= t_cap else t_cap
    return t_tile, pl.cdiv(T, t_tile)


# ---------------------------------------------------------------------------
# pallas_call wrappers
# ---------------------------------------------------------------------------
def _fused_forward(x_lhs, x_rhs_col, y_macro_col, left_layers, right_layers, t_cap):
    B, n_alphas, T = x_lhs.shape
    F = left_layers[-1]["WT"].shape[0]
    t_tile, grid_t = _time_tiling(T, t_cap)

    left_in, left_specs = _param_inputs_and_specs(left_layers)
    right_in, right_specs = _param_inputs_and_specs(right_layers)
    kernel = functools.partial(
        _fused_kernel_with_rhs,
        left_flags=_flags(left_layers), right_flags=_flags(right_layers),
        n_left=len(left_in), n_right=len(right_in))

    out3, rhs3 = pl.pallas_call(
        kernel,
        out_shape=(jax.ShapeDtypeStruct((B, 1, T), jnp.float32),
                   jax.ShapeDtypeStruct((B, F, 1), jnp.float32)),
        grid=(B, grid_t),
        in_specs=[
            pl.BlockSpec((pl.Squeezed(), n_alphas, t_tile), lambda b, t: (b, 0, t)),
            pl.BlockSpec((pl.Squeezed(),) + x_rhs_col.shape[1:], lambda b, t: (b, 0, 0)),
            pl.BlockSpec((pl.Squeezed(), F, 1), lambda b, t: (b, 0, 0)),
        ] + left_specs + right_specs,
        out_specs=(
            pl.BlockSpec((pl.Squeezed(), 1, t_tile), lambda b, t: (b, 0, t)),
            pl.BlockSpec((pl.Squeezed(), F, 1), lambda b, t: (b, 0, 0)),
        ),
        scratch_shapes=[pltpu.VMEM((F, 1), jnp.float32)],
        compiler_params=pltpu.CompilerParams(
            dimension_semantics=("parallel", "arbitrary")),
    )(x_lhs, x_rhs_col, y_macro_col, *left_in, *right_in)
    return out3, rhs3


def _fused_forward_given_scale(x_lhs, scale_col, left_layers, t_cap):
    B, n_alphas, T = x_lhs.shape
    F = left_layers[-1]["WT"].shape[0]
    t_tile, grid_t = _time_tiling(T, t_cap)

    left_in, left_specs = _param_inputs_and_specs(left_layers)
    kernel = functools.partial(_fused_kernel_given_scale,
                               left_flags=_flags(left_layers), n_left=len(left_in))
    return pl.pallas_call(
        kernel,
        out_shape=jax.ShapeDtypeStruct((B, 1, T), jnp.float32),
        grid=(B, grid_t),
        in_specs=[
            pl.BlockSpec((pl.Squeezed(), n_alphas, t_tile), lambda b, t: (b, 0, t)),
            pl.BlockSpec((pl.Squeezed(), F, 1), lambda b, t: (b, 0, 0)),
        ] + left_specs,
        out_specs=pl.BlockSpec((pl.Squeezed(), 1, t_tile), lambda b, t: (b, 0, t)),
        compiler_params=pltpu.CompilerParams(
            dimension_semantics=("parallel", "parallel")),
    )(x_lhs, scale_col, *left_in)


# ---------------------------------------------------------------------------
# Parameter construction (mirrors buildListFromConfigs; dropout_p = 0).
# Weights stored in the transposed layout the kernel consumes.
# ---------------------------------------------------------------------------
def build_mlp_params(key, config, inp_size, out_size, use_batch_norm, nonlinear_active):
    sizes = list(config) + [out_size]
    layers = []
    d_in = inp_size
    for i, v in enumerate(sizes):
        use_ln = bool(use_batch_norm) and i > 0              # LayerNorm before Linear
        use_selu = bool(nonlinear_active) and (i < len(config))
        key, kw, kb = jax.random.split(key, 3)
        std = 1.0 / (d_in ** 0.5)                            # kaiming_normal_, fan_in, 'linear'
        WT = jax.random.normal(kw, (v, d_in), jnp.float32) * std
        b = jax.random.uniform(kb, (v, 1), jnp.float32, minval=-std, maxval=std)
        layers.append(dict(
            WT=WT, b=b,
            gamma=jnp.ones((d_in, 1), jnp.float32),          # nn.LayerNorm default affine
            beta=jnp.zeros((d_in, 1), jnp.float32),
            use_ln=use_ln, use_selu=use_selu))
        d_in = v
    return layers, key


# ---------------------------------------------------------------------------
# Full model forward (mirrors `model.forward`)
# ---------------------------------------------------------------------------
def model_forward(params, x_macro, macro_idx, x_lhs, x_rhs, rhs=None, t_cap=T_CAP):
    B, n_alphas, T = x_lhs.shape
    n_factors = params["left"][-1]["WT"].shape[0]
    # Macro branch: RegimeMacro reduces to identity on x_macro (see NOTE above).
    assert x_macro.shape[-1] == n_factors, "reference broadcast needs n_macro == n_factors"
    y_macro = x_macro[0, macro_idx, :]                       # (B, F)

    if rhs is None:
        out3, rhs = _fused_forward(
            x_lhs,
            x_rhs[:, :, None],                               # (B, n_alphas+1, 1)
            y_macro[:, :, None],                             # (B, F, 1)
            params["left"], params["right"], t_cap)
    else:
        scale = (rhs[:, :, 0] * y_macro)[:, :, None]         # (B, F, 1)
        out3 = _fused_forward_given_scale(x_lhs, scale, params["left"], t_cap)
    return out3.reshape(B, T), rhs


# ---------------------------------------------------------------------------
# Pure-JAX reference (same math, row-major) for correctness checking.
# ---------------------------------------------------------------------------
def _mlp_ref(x, layers):
    y = x
    for l in layers:
        if l["use_ln"]:
            mu = jnp.mean(y, axis=-1, keepdims=True)
            var = jnp.mean((y - mu) ** 2, axis=-1, keepdims=True)
            y = (y - mu) * jax.lax.rsqrt(var + LN_EPS)
            y = y * l["gamma"][:, 0] + l["beta"][:, 0]
        y = jnp.dot(y, l["WT"].T, precision=jax.lax.Precision.HIGHEST) + l["b"][:, 0]
        if l["use_selu"]:
            y = SELU_SCALE * jnp.where(
                y > 0.0, y, SELU_ALPHA * (jnp.exp(jnp.minimum(y, 0.0)) - 1.0))
    return y


def model_forward_ref(params, x_macro, macro_idx, x_lhs, x_rhs, rhs=None):
    B, n_alphas, T = x_lhs.shape
    rows = jnp.transpose(x_lhs, (0, 2, 1)).reshape(B * T, n_alphas)
    y_lhs = _mlp_ref(rows, params["left"]).reshape(B, T, -1).transpose(0, 2, 1)
    if rhs is None:
        rhs = _mlp_ref(x_rhs, params["right"])[:, :, None]
    y_macro = x_macro[0, macro_idx, :][:, :, None]
    out = jnp.sum(y_lhs * rhs * y_macro, axis=1)
    return out, rhs


# ---------------------------------------------------------------------------
# Demo
# ---------------------------------------------------------------------------
if __name__ == "__main__":
    n_alphas, n_factors = 16, 4
    n_macro = n_factors          # required by the reference broadcast
    n_hidden_lhs = (32, 32)
    n_hidden_rhs = (32,)
    B, T, M = 2, 8, 8            # batch, lhs time steps, macro time steps

    key = jax.random.PRNGKey(0)
    key, k_left = jax.random.split(key)
    left_layers, _ = build_mlp_params(k_left, n_hidden_lhs, n_alphas, n_factors,
                                      use_batch_norm=True, nonlinear_active=True)
    key, k_right = jax.random.split(key)
    right_layers, _ = build_mlp_params(k_right, n_hidden_rhs, n_alphas + 1, n_factors,
                                       use_batch_norm=False, nonlinear_active=True)
    params = {"left": left_layers, "right": right_layers}

    key, k1, k2, k3 = jax.random.split(key, 4)
    x_macro = jax.random.normal(k1, (1, M, n_macro), jnp.float32)
    macro_idx = jnp.array([1, 5], dtype=jnp.int32)           # (B,)
    x_lhs = jax.random.normal(k2, (B, n_alphas, T), jnp.float32)
    x_rhs = jax.random.normal(k3, (B, n_alphas + 1), jnp.float32)

    # Main path (rhs computed in-kernel).
    out, rhs = model_forward(params, x_macro, macro_idx, x_lhs, x_rhs)
    jax.block_until_ready((out, rhs))
    assert out.shape == (B, T) and rhs.shape == (B, n_factors, 1)
    out_ref, rhs_ref = model_forward_ref(params, x_macro, macro_idx, x_lhs, x_rhs)
    np.testing.assert_allclose(np.asarray(out), np.asarray(out_ref), rtol=2e-3, atol=2e-3)
    np.testing.assert_allclose(np.asarray(rhs), np.asarray(rhs_ref), rtol=2e-3, atol=2e-3)

    # Provided-`rhs` path.
    out2, _ = model_forward(params, x_macro, macro_idx, x_lhs, x_rhs, rhs=rhs)
    jax.block_until_ready(out2)
    np.testing.assert_allclose(np.asarray(out2), np.asarray(out_ref), rtol=2e-3, atol=2e-3)

    # Multi-tile time grid with a partial last block (scale scratch reused
    # across time tiles of a batch; masked writeback on the ragged tile).
    T2 = 320
    key, k4 = jax.random.split(key)
    x_lhs2 = jax.random.normal(k4, (B, n_alphas, T2), jnp.float32)
    out_big, _ = model_forward(params, x_macro, macro_idx, x_lhs2, x_rhs, t_cap=128)
    jax.block_until_ready(out_big)
    out_big_ref, _ = model_forward_ref(params, x_macro, macro_idx, x_lhs2, x_rhs)
    np.testing.assert_allclose(np.asarray(out_big), np.asarray(out_big_ref),
                               rtol=2e-3, atol=2e-3)

    print("KERNEL_OK")
</pallas_src>

<mosaic_0001>
module attributes {stable_mosaic.version = 11 : i64} {
  func.func @_fused_kernel_with_rhs(%arg0: i32, %arg1: i32, %arg2: memref<1x16x8xf32, #tpu.memory_space<vmem>>, %arg3: memref<1x17x1xf32, #tpu.memory_space<vmem>>, %arg4: memref<1x4x1xf32, #tpu.memory_space<vmem>>, %arg5: memref<32x16xf32, #tpu.memory_space<vmem>>, %arg6: memref<32x1xf32, #tpu.memory_space<vmem>>, %arg7: memref<32x32xf32, #tpu.memory_space<vmem>>, %arg8: memref<32x1xf32, #tpu.memory_space<vmem>>, %arg9: memref<32x1xf32, #tpu.memory_space<vmem>>, %arg10: memref<32x1xf32, #tpu.memory_space<vmem>>, %arg11: memref<4x32xf32, #tpu.memory_space<vmem>>, %arg12: memref<4x1xf32, #tpu.memory_space<vmem>>, %arg13: memref<32x1xf32, #tpu.memory_space<vmem>>, %arg14: memref<32x1xf32, #tpu.memory_space<vmem>>, %arg15: memref<32x17xf32, #tpu.memory_space<vmem>>, %arg16: memref<32x1xf32, #tpu.memory_space<vmem>>, %arg17: memref<4x32xf32, #tpu.memory_space<vmem>>, %arg18: memref<4x1xf32, #tpu.memory_space<vmem>>, %arg19: memref<1x1x8xf32, #tpu.memory_space<vmem>>, %arg20: memref<1x4x1xf32, #tpu.memory_space<vmem>>, %arg21: memref<4x1xf32, #tpu.memory_space<vmem>>) attributes {dimension_semantics = [#tpu.dimension_semantics<parallel>, #tpu.dimension_semantics<arbitrary>], iteration_bounds = array<i64: 2, 1>, scalar_prefetch = 0 : i64, scratch_operands = 1 : i64, tpu.core_type = #tpu.core_type<tc>, window_params = [{transform_indices = @transform_0, window_bounds = array<i64: 1, 16, 8>}, {transform_indices = @transform_1, window_bounds = array<i64: 1, 17, 1>}, {transform_indices = @transform_2, window_bounds = array<i64: 1, 4, 1>}, {pipeline_mode = #tpu.pipeline_mode<synchronous>, transform_indices = @transform_3, window_bounds = array<i64: 32, 16>}, {pipeline_mode = #tpu.pipeline_mode<synchronous>, transform_indices = @transform_4, window_bounds = array<i64: 32, 1>}, {pipeline_mode = #tpu.pipeline_mode<synchronous>, transform_indices = @transform_5, window_bounds = array<i64: 32, 32>}, {pipeline_mode = #tpu.pipeline_mode<synchronous>, transform_indices = @transform_6, window_bounds = array<i64: 32, 1>}, {pipeline_mode = #tpu.pipeline_mode<synchronous>, transform_indices = @transform_7, window_bounds = array<i64: 32, 1>}, {pipeline_mode = #tpu.pipeline_mode<synchronous>, transform_indices = @transform_8, window_bounds = array<i64: 32, 1>}, {pipeline_mode = #tpu.pipeline_mode<synchronous>, transform_indices = @transform_9, window_bounds = array<i64: 4, 32>}, {pipeline_mode = #tpu.pipeline_mode<synchronous>, transform_indices = @transform_10, window_bounds = array<i64: 4, 1>}, {pipeline_mode = #tpu.pipeline_mode<synchronous>, transform_indices = @transform_11, window_bounds = array<i64: 32, 1>}, {pipeline_mode = #tpu.pipeline_mode<synchronous>, transform_indices = @transform_12, window_bounds = array<i64: 32, 1>}, {pipeline_mode = #tpu.pipeline_mode<synchronous>, transform_indices = @transform_13, window_bounds = array<i64: 32, 17>}, {pipeline_mode = #tpu.pipeline_mode<synchronous>, transform_indices = @transform_14, window_bounds = array<i64: 32, 1>}, {pipeline_mode = #tpu.pipeline_mode<synchronous>, transform_indices = @transform_15, window_bounds = array<i64: 4, 32>}, {pipeline_mode = #tpu.pipeline_mode<synchronous>, transform_indices = @transform_16, window_bounds = array<i64: 4, 1>}, {transform_indices = @transform_17, window_bounds = array<i64: 1, 1, 8>}, {transform_indices = @transform_18, window_bounds = array<i64: 1, 4, 1>}]} {
    %c0_i32 = arith.constant 0 : i32
    %0 = arith.cmpi eq, %arg1, %c0_i32 : i32
    %1 = arith.extui %0 : i1 to i32
    %c0_i32_0 = arith.constant 0 : i32
    %2 = arith.cmpi ne, %1, %c0_i32_0 : i32
    scf.if %2 {
      %c0_51 = arith.constant 0 : index
      %c0_52 = arith.constant 0 : index
      %c0_53 = arith.constant 0 : index
      %100 = vector.load %arg3[%c0_51, %c0_52, %c0_53] : memref<1x17x1xf32, #tpu.memory_space<vmem>>, vector<1x17x1xf32>
      %101 = vector.shape_cast %100 : vector<1x17x1xf32> to vector<17x1xf32>
      %c0_54 = arith.constant 0 : index
      %c0_55 = arith.constant 0 : index
      %102 = vector.load %arg15[%c0_54, %c0_55] : memref<32x17xf32, #tpu.memory_space<vmem>>, vector<32x17xf32>
      %cst_56 = arith.constant dense<0.000000e+00> : vector<32x1xf32>
      %103 = tpu.matmul %102, %101, %cst_56 {dimension_numbers = #tpu.dot_dimension_numbers<[1], [0], [0], [1], [0, 0, 1, 1], [], []>} : vector<32x17xf32>, vector<17x1xf32>, vector<32x1xf32> -> vector<32x1xf32>
      %c0_57 = arith.constant 0 : index
      %c0_58 = arith.constant 0 : index
      %104 = vector.load %arg16[%c0_57, %c0_58] : memref<32x1xf32, #tpu.memory_space<vmem>>, vector<32x1xf32>
      %105 = arith.addf %103, %104 : vector<32x1xf32>
      %cst_59 = arith.constant 0.000000e+00 : f32
      %106 = vector.broadcast %cst_59 : f32 to vector<32x1xf32>
      %107 = arith.cmpf ogt, %105, %106 : vector<32x1xf32>
      %cst_60 = arith.constant 0.000000e+00 : f32
      %108 = vector.broadcast %cst_60 : f32 to vector<32x1xf32>
      %109 = arith.minimumf %105, %108 : vector<32x1xf32>
      %110 = math.exp %109 : vector<32x1xf32>
      %cst_61 = arith.constant 1.000000e+00 : f32
      %111 = vector.broadcast %cst_61 : f32 to vector<32x1xf32>
      %112 = arith.subf %110, %111 : vector<32x1xf32>
      %cst_62 = arith.constant 1.67326319 : f32
      %113 = vector.broadcast %cst_62 : f32 to vector<32x1xf32>
      %114 = arith.mulf %113, %112 : vector<32x1xf32>
      %115 = arith.select %107, %105, %114 : vector<32x1xi1>, vector<32x1xf32>
      %cst_63 = arith.constant 1.05070102 : f32
      %116 = vector.broadcast %cst_63 : f32 to vector<32x1xf32>
      %117 = arith.mulf %116, %115 : vector<32x1xf32>
      %c0_64 = arith.constant 0 : index
      %c0_65 = arith.constant 0 : index
      %118 = vector.load %arg17[%c0_64, %c0_65] : memref<4x32xf32, #tpu.memory_space<vmem>>, vector<4x32xf32>
      %cst_66 = arith.constant dense<0.000000e+00> : vector<4x1xf32>
      %119 = tpu.matmul %118, %117, %cst_66 {dimension_numbers = #tpu.dot_dimension_numbers<[1], [0], [0], [1], [0, 0, 1, 1], [], []>} : vector<4x32xf32>, vector<32x1xf32>, vector<4x1xf32> -> vector<4x1xf32>
      %c0_67 = arith.constant 0 : index
      %c0_68 = arith.constant 0 : index
      %120 = vector.load %arg18[%c0_67, %c0_68] : memref<4x1xf32, #tpu.memory_space<vmem>>, vector<4x1xf32>
      %121 = arith.addf %119, %120 : vector<4x1xf32>
      %c0_69 = arith.constant 0 : index
      %c0_70 = arith.constant 0 : index
      %c0_71 = arith.constant 0 : index
      %122 = vector.load %arg20[%c0_69, %c0_70, %c0_71] : memref<1x4x1xf32, #tpu.memory_space<vmem>>, vector<1x4x1xf32>
      %123 = vector.shape_cast %122 : vector<1x4x1xf32> to vector<4x1xf32>
      %124 = vector.shape_cast %121 : vector<4x1xf32> to vector<1x4x1xf32>
      tpu.vector_store %arg20[%c0_69, %c0_70, %c0_71], %124 {strides = array<i32>} : memref<1x4x1xf32, #tpu.memory_space<vmem>>, vector<1x4x1xf32>,
      %c0_72 = arith.constant 0 : index
      %c0_73 = arith.constant 0 : index
      %c0_74 = arith.constant 0 : index
      %125 = vector.load %arg4[%c0_72, %c0_73, %c0_74] : memref<1x4x1xf32, #tpu.memory_space<vmem>>, vector<1x4x1xf32>
      %126 = vector.shape_cast %125 : vector<1x4x1xf32> to vector<4x1xf32>
      %127 = arith.mulf %121, %126 : vector<4x1xf32>
      %c0_75 = arith.constant 0 : index
      %c0_76 = arith.constant 0 : index
      %128 = vector.load %arg21[%c0_75, %c0_76] : memref<4x1xf32, #tpu.memory_space<vmem>>, vector<4x1xf32>
      tpu.vector_store %arg21[%c0_75, %c0_76], %127 {strides = array<i32>} : memref<4x1xf32, #tpu.memory_space<vmem>>, vector<4x1xf32>,
    } else {
    }
    %c0 = arith.constant 0 : index
    %c0_1 = arith.constant 0 : index
    %c0_2 = arith.constant 0 : index
    %3 = vector.load %arg2[%c0, %c0_1, %c0_2] : memref<1x16x8xf32, #tpu.memory_space<vmem>>, vector<1x16x8xf32>
    %4 = vector.shape_cast %3 : vector<1x16x8xf32> to vector<16x8xf32>
    %c0_3 = arith.constant 0 : index
    %c0_4 = arith.constant 0 : index
    %5 = vector.load %arg5[%c0_3, %c0_4] : memref<32x16xf32, #tpu.memory_space<vmem>>, vector<32x16xf32>
    %cst = arith.constant dense<0.000000e+00> : vector<32x8xf32>
    %6 = tpu.matmul %5, %4, %cst {dimension_numbers = #tpu.dot_dimension_numbers<[1], [0], [0], [1], [0, 0, 1, 1], [], []>} : vector<32x16xf32>, vector<16x8xf32>, vector<32x8xf32> -> vector<32x8xf32>
    %c0_5 = arith.constant 0 : index
    %c0_6 = arith.constant 0 : index
    %7 = vector.load %arg6[%c0_5, %c0_6] : memref<32x1xf32, #tpu.memory_space<vmem>>, vector<32x1xf32>
    %8 = vector.broadcast %7 : vector<32x1xf32> to vector<32x8xf32>
    %9 = arith.addf %6, %8 : vector<32x8xf32>
    %cst_7 = arith.constant 0.000000e+00 : f32
    %10 = vector.broadcast %cst_7 : f32 to vector<32x8xf32>
    %11 = arith.cmpf ogt, %9, %10 : vector<32x8xf32>
    %cst_8 = arith.constant 0.000000e+00 : f32
    %12 = vector.broadcast %cst_8 : f32 to vector<32x8xf32>
    %13 = arith.minimumf %9, %12 : vector<32x8xf32>
    %14 = math.exp %13 : vector<32x8xf32>
    %cst_9 = arith.constant 1.000000e+00 : f32
    %15 = vector.broadcast %cst_9 : f32 to vector<32x8xf32>
    %16 = arith.subf %14, %15 : vector<32x8xf32>
    %cst_10 = arith.constant 1.67326319 : f32
    %17 = vector.broadcast %cst_10 : f32 to vector<32x8xf32>
    %18 = arith.mulf %17, %16 : vector<32x8xf32>
    %19 = arith.select %11, %9, %18 : vector<32x8xi1>, vector<32x8xf32>
    %cst_11 = arith.constant 1.05070102 : f32
    %20 = vector.broadcast %cst_11 : f32 to vector<32x8xf32>
    %21 = arith.mulf %20, %19 : vector<32x8xf32>
    %cst_12 = arith.constant dense<0.000000e+00> : vector<8xf32>
    %22 = vector.multi_reduction <add>, %21, %cst_12 [0] : vector<32x8xf32> to vector<8xf32>
    %23 = vector.shape_cast %22 : vector<8xf32> to vector<1x8xf32>
    %cst_13 = arith.constant 3.200000e+01 : f32
    %24 = vector.broadcast %cst_13 : f32 to vector<1x8xf32>
    %25 = arith.divf %23, %24 : vector<1x8xf32>
    %26 = vector.broadcast %25 : vector<1x8xf32> to vector<32x8xf32>
    %27 = arith.subf %21, %26 : vector<32x8xf32>
    %28 = arith.mulf %27, %27 : vector<32x8xf32>
    %cst_14 = arith.constant dense<0.000000e+00> : vector<8xf32>
    %29 = vector.multi_reduction <add>, %28, %cst_14 [0] : vector<32x8xf32> to vector<8xf32>
    %30 = vector.shape_cast %29 : vector<8xf32> to vector<1x8xf32>
    %cst_15 = arith.constant 3.200000e+01 : f32
    %31 = vector.broadcast %cst_15 : f32 to vector<1x8xf32>
    %32 = arith.divf %30, %31 : vector<1x8xf32>
    %33 = vector.broadcast %25 : vector<1x8xf32> to vector<32x8xf32>
    %34 = arith.subf %21, %33 : vector<32x8xf32>
    %cst_16 = arith.constant 9.99999974E-6 : f32
    %35 = vector.broadcast %cst_16 : f32 to vector<1x8xf32>
    %36 = arith.addf %32, %35 : vector<1x8xf32>
    %37 = math.rsqrt %36 : vector<1x8xf32>
    %38 = vector.broadcast %37 : vector<1x8xf32> to vector<32x8xf32>
    %39 = arith.mulf %34, %38 : vector<32x8xf32>
    %c0_17 = arith.constant 0 : index
    %c0_18 = arith.constant 0 : index
    %40 = vector.load %arg9[%c0_17, %c0_18] : memref<32x1xf32, #tpu.memory_space<vmem>>, vector<32x1xf32>
    %41 = vector.broadcast %40 : vector<32x1xf32> to vector<32x8xf32>
    %42 = arith.mulf %39, %41 : vector<32x8xf32>
    %c0_19 = arith.constant 0 : index
    %c0_20 = arith.constant 0 : index
    %43 = vector.load %arg10[%c0_19, %c0_20] : memref<32x1xf32, #tpu.memory_space<vmem>>, vector<32x1xf32>
    %44 = vector.broadcast %43 : vector<32x1xf32> to vector<32x8xf32>
    %45 = arith.addf %42, %44 : vector<32x8xf32>
    %c0_21 = arith.constant 0 : index
    %c0_22 = arith.constant 0 : index
    %46 = vector.load %arg7[%c0_21, %c0_22] : memref<32x32xf32, #tpu.memory_space<vmem>>, vector<32x32xf32>
    %cst_23 = arith.constant dense<0.000000e+00> : vector<32x8xf32>
    %47 = tpu.matmul %46, %45, %cst_23 {dimension_numbers = #tpu.dot_dimension_numbers<[1], [0], [0], [1], [0, 0, 1, 1], [], []>} : vector<32x32xf32>, vector<32x8xf32>, vector<32x8xf32> -> vector<32x8xf32>
    %c0_24 = arith.constant 0 : index
    %c0_25 = arith.constant 0 : index
    %48 = vector.load %arg8[%c0_24, %c0_25] : memref<32x1xf32, #tpu.memory_space<vmem>>, vector<32x1xf32>
    %49 = vector.broadcast %48 : vector<32x1xf32> to vector<32x8xf32>
    %50 = arith.addf %47, %49 : vector<32x8xf32>
    %cst_26 = arith.constant 0.000000e+00 : f32
    %51 = vector.broadcast %cst_26 : f32 to vector<32x8xf32>
    %52 = arith.cmpf ogt, %50, %51 : vector<32x8xf32>
    %cst_27 = arith.constant 0.000000e+00 : f32
    %53 = vector.broadcast %cst_27 : f32 to vector<32x8xf32>
    %54 = arith.minimumf %50, %53 : vector<32x8xf32>
    %55 = math.exp %54 : vector<32x8xf32>
    %cst_28 = arith.constant 1.000000e+00 : f32
    %56 = vector.broadcast %cst_28 : f32 to vector<32x8xf32>
    %57 = arith.subf %55, %56 : vector<32x8xf32>
    %cst_29 = arith.constant 1.67326319 : f32
    %58 = vector.broadcast %cst_29 : f32 to vector<32x8xf32>
    %59 = arith.mulf %58, %57 : vector<32x8xf32>
    %60 = arith.select %52, %50, %59 : vector<32x8xi1>, vector<32x8xf32>
    %cst_30 = arith.constant 1.05070102 : f32
    %61 = vector.broadcast %cst_30 : f32 to vector<32x8xf32>
    %62 = arith.mulf %61, %60 : vector<32x8xf32>
    %cst_31 = arith.constant dense<0.000000e+00> : vector<8xf32>
    %63 = vector.multi_reduction <add>, %62, %cst_31 [0] : vector<32x8xf32> to vector<8xf32>
    %64 = vector.shape_cast %63 : vector<8xf32> to vector<1x8xf32>
    %cst_32 = arith.constant 3.200000e+01 : f32
    %65 = vector.broadcast %cst_32 : f32 to vector<1x8xf32>
    %66 = arith.divf %64, %65 : vector<1x8xf32>
    %67 = vector.broadcast %66 : vector<1x8xf32> to vector<32x8xf32>
    %68 = arith.subf %62, %67 : vector<32x8xf32>
    %69 = arith.mulf %68, %68 : vector<32x8xf32>
    %cst_33 = arith.constant dense<0.000000e+00> : vector<8xf32>
    %70 = vector.multi_reduction <add>, %69, %cst_33 [0] : vector<32x8xf32> to vector<8xf32>
    %71 = vector.shape_cast %70 : vector<8xf32> to vector<1x8xf32>
    %cst_34 = arith.constant 3.200000e+01 : f32
    %72 = vector.broadcast %cst_34 : f32 to vector<1x8xf32>
    %73 = arith.divf %71, %72 : vector<1x8xf32>
    %74 = vector.broadcast %66 : vector<1x8xf32> to vector<32x8xf32>
    %75 = arith.subf %62, %74 : vector<32x8xf32>
    %cst_35 = arith.constant 9.99999974E-6 : f32
    %76 = vector.broadcast %cst_35 : f32 to vector<1x8xf32>
    %77 = arith.addf %73, %76 : vector<1x8xf32>
    %78 = math.rsqrt %77 : vector<1x8xf32>
    %79 = vector.broadcast %78 : vector<1x8xf32> to vector<32x8xf32>
    %80 = arith.mulf %75, %79 : vector<32x8xf32>
    %c0_36 = arith.constant 0 : index
    %c0_37 = arith.constant 0 : index
    %81 = vector.load %arg13[%c0_36, %c0_37] : memref<32x1xf32, #tpu.memory_space<vmem>>, vector<32x1xf32>
    %82 = vector.broadcast %81 : vector<32x1xf32> to vector<32x8xf32>
    %83 = arith.mulf %80, %82 : vector<32x8xf32>
    %c0_38 = arith.constant 0 : index
    %c0_39 = arith.constant 0 : index
    %84 = vector.load %arg14[%c0_38, %c0_39] : memref<32x1xf32, #tpu.memory_space<vmem>>, vector<32x1xf32>
    %85 = vector.broadcast %84 : vector<32x1xf32> to vector<32x8xf32>
    %86 = arith.addf %83, %85 : vector<32x8xf32>
    %c0_40 = arith.constant 0 : index
    %c0_41 = arith.constant 0 : index
    %87 = vector.load %arg11[%c0_40, %c0_41] : memref<4x32xf32, #tpu.memory_space<vmem>>, vector<4x32xf32>
    %cst_42 = arith.constant dense<0.000000e+00> : vector<4x8xf32>
    %88 = tpu.matmul %87, %86, %cst_42 {dimension_numbers = #tpu.dot_dimension_numbers<[1], [0], [0], [1], [0, 0, 1, 1], [], []>} : vector<4x32xf32>, vector<32x8xf32>, vector<4x8xf32> -> vector<4x8xf32>
    %c0_43 = arith.constant 0 : index
    %c0_44 = arith.constant 0 : index
    %89 = vector.load %arg12[%c0_43, %c0_44] : memref<4x1xf32, #tpu.memory_space<vmem>>, vector<4x1xf32>
    %90 = vector.broadcast %89 : vector<4x1xf32> to vector<4x8xf32>
    %91 = arith.addf %88, %90 : vector<4x8xf32>
    %c0_45 = arith.constant 0 : index
    %c0_46 = arith.constant 0 : index
    %92 = vector.load %arg21[%c0_45, %c0_46] : memref<4x1xf32, #tpu.memory_space<vmem>>, vector<4x1xf32>
    %93 = vector.broadcast %92 : vector<4x1xf32> to vector<4x8xf32>
    %94 = arith.mulf %91, %93 : vector<4x8xf32>
    %cst_47 = arith.constant dense<0.000000e+00> : vector<8xf32>
    %95 = vector.multi_reduction <add>, %94, %cst_47 [0] : vector<4x8xf32> to vector<8xf32>
    %96 = vector.shape_cast %95 : vector<8xf32> to vector<1x8xf32>
    %c0_48 = arith.constant 0 : index
    %c0_49 = arith.constant 0 : index
    %c0_50 = arith.constant 0 : index
    %97 = vector.load %arg19[%c0_48, %c0_49, %c0_50] : memref<1x1x8xf32, #tpu.memory_space<vmem>>, vector<1x1x8xf32>
    %98 = vector.shape_cast %97 : vector<1x1x8xf32> to vector<1x8xf32>
    %99 = vector.shape_cast %96 : vector<1x8xf32> to vector<1x1x8xf32>
    tpu.vector_store %arg19[%c0_48, %c0_49, %c0_50], %99 {strides = array<i32>} : memref<1x1x8xf32, #tpu.memory_space<vmem>>, vector<1x1x8xf32>,
    return
  }
  func.func @transform_0(%arg0: i32, %arg1: i32) -> (i32, i32, i32) {
    %c0_i32 = arith.constant 0 : i32
    %c0_i32_0 = arith.constant 0 : i32
    return %arg0, %c0_i32, %arg1 : i32, i32, i32
  }
  func.func @transform_1(%arg0: i32, %arg1: i32) -> (i32, i32, i32) {
    %c0_i32 = arith.constant 0 : i32
    %c0_i32_0 = arith.constant 0 : i32
    %c0_i32_1 = arith.constant 0 : i32
    return %arg0, %c0_i32, %c0_i32_0 : i32, i32, i32
  }
  func.func @transform_2(%arg0: i32, %arg1: i32) -> (i32, i32, i32) {
    %c0_i32 = arith.constant 0 : i32
    %c0_i32_0 = arith.constant 0 : i32
    %c0_i32_1 = arith.constant 0 : i32
    return %arg0, %c0_i32, %c0_i32_0 : i32, i32, i32
  }
  func.func @transform_3(%arg0: i32, %arg1: i32) -> (i32, i32) {
    %c0_i32 = arith.constant 0 : i32
    %c0_i32_0 = arith.constant 0 : i32
    %c0_i32_1 = arith.constant 0 : i32
    return %c0_i32, %c0_i32_0 : i32, i32
  }
  func.func @transform_4(%arg0: i32, %arg1: i32) -> (i32, i32) {
    %c0_i32 = arith.constant 0 : i32
    %c0_i32_0 = arith.constant 0 : i32
    %c0_i32_1 = arith.constant 0 : i32
    return %c0_i32, %c0_i32_0 : i32, i32
  }
  func.func @transform_5(%arg0: i32, %arg1: i32) -> (i32, i32) {
    %c0_i32 = arith.constant 0 : i32
    %c0_i32_0 = arith.constant 0 : i32
    %c0_i32_1 = arith.constant 0 : i32
    return %c0_i32, %c0_i32_0 : i32, i32
  }
  func.func @transform_6(%arg0: i32, %arg1: i32) -> (i32, i32) {
    %c0_i32 = arith.constant 0 : i32
    %c0_i32_0 = arith.constant 0 : i32
    %c0_i32_1 = arith.constant 0 : i32
    return %c0_i32, %c0_i32_0 : i32, i32
  }
  func.func @transform_7(%arg0: i32, %arg1: i32) -> (i32, i32) {
    %c0_i32 = arith.constant 0 : i32
    %c0_i32_0 = arith.constant 0 : i32
    %c0_i32_1 = arith.constant 0 : i32
    return %c0_i32, %c0_i32_0 : i32, i32
  }
  func.func @transform_8(%arg0: i32, %arg1: i32) -> (i32, i32) {
    %c0_i32 = arith.constant 0 : i32
    %c0_i32_0 = arith.constant 0 : i32
    %c0_i32_1 = arith.constant 0 : i32
    return %c0_i32, %c0_i32_0 : i32, i32
  }
  func.func @transform_9(%arg0: i32, %arg1: i32) -> (i32, i32) {
    %c0_i32 = arith.constant 0 : i32
    %c0_i32_0 = arith.constant 0 : i32
    %c0_i32_1 = arith.constant 0 : i32
    return %c0_i32, %c0_i32_0 : i32, i32
  }
  func.func @transform_10(%arg0: i32, %arg1: i32) -> (i32, i32) {
    %c0_i32 = arith.constant 0 : i32
    %c0_i32_0 = arith.constant 0 : i32
    %c0_i32_1 = arith.constant 0 : i32
    return %c0_i32, %c0_i32_0 : i32, i32
  }
  func.func @transform_11(%arg0: i32, %arg1: i32) -> (i32, i32) {
    %c0_i32 = arith.constant 0 : i32
    %c0_i32_0 = arith.constant 0 : i32
    %c0_i32_1 = arith.constant 0 : i32
    return %c0_i32, %c0_i32_0 : i32, i32
  }
  func.func @transform_12(%arg0: i32, %arg1: i32) -> (i32, i32) {
    %c0_i32 = arith.constant 0 : i32
    %c0_i32_0 = arith.constant 0 : i32
    %c0_i32_1 = arith.constant 0 : i32
    return %c0_i32, %c0_i32_0 : i32, i32
  }
  func.func @transform_13(%arg0: i32, %arg1: i32) -> (i32, i32) {
    %c0_i32 = arith.constant 0 : i32
    %c0_i32_0 = arith.constant 0 : i32
    %c0_i32_1 = arith.constant 0 : i32
    return %c0_i32, %c0_i32_0 : i32, i32
  }
  func.func @transform_14(%arg0: i32, %arg1: i32) -> (i32, i32) {
    %c0_i32 = arith.constant 0 : i32
    %c0_i32_0 = arith.constant 0 : i32
    %c0_i32_1 = arith.constant 0 : i32
    return %c0_i32, %c0_i32_0 : i32, i32
  }
  func.func @transform_15(%arg0: i32, %arg1: i32) -> (i32, i32) {
    %c0_i32 = arith.constant 0 : i32
    %c0_i32_0 = arith.constant 0 : i32
    %c0_i32_1 = arith.constant 0 : i32
    return %c0_i32, %c0_i32_0 : i32, i32
  }
  func.func @transform_16(%arg0: i32, %arg1: i32) -> (i32, i32) {
    %c0_i32 = arith.constant 0 : i32
    %c0_i32_0 = arith.constant 0 : i32
    %c0_i32_1 = arith.constant 0 : i32
    return %c0_i32, %c0_i32_0 : i32, i32
  }
  func.func @transform_17(%arg0: i32, %arg1: i32) -> (i32, i32, i32) {
    %c0_i32 = arith.constant 0 : i32
    %c0_i32_0 = arith.constant 0 : i32
    return %arg0, %c0_i32, %arg1 : i32, i32, i32
  }
  func.func @transform_18(%arg0: i32, %arg1: i32) -> (i32, i32, i32) {
    %c0_i32 = arith.constant 0 : i32
    %c0_i32_0 = arith.constant 0 : i32
    %c0_i32_1 = arith.constant 0 : i32
    return %arg0, %c0_i32, %c0_i32_0 : i32, i32, i32
  }
}

</mosaic_0001>

<bundles_post_ra>
// kernel: tpu_custom_call.1
= control target key start
LH: loop header
LB: loop body
LE: loop exit
PB: predicated region body
PF: predicated region fallthrough
CT: control target
= control target key end

     0   :  { %s2348_s0 = inlined_call_operand.vmem [shape: f32[2,16,8], index: 0, kind: input, shape index: {}]   ;;  %s2349_s1 = inlined_call_operand.vmem [shape: f32[2,17,1], index: 1, kind: input, shape index: {}]   ;;  %s2350_s2 = inlined_call_operand.vmem [shape: f32[2,4,1], index: 2, kind: input, shape index: {}]   ;;  %s2351_s3 = inlined_call_operand.vmem [shape: f32[32,16], index: 3, kind: input, shape index: {}]   ;;  %s2352_s4 = inlined_call_operand.vmem [shape: f32[32,1], index: 4, kind: input, shape index: {}]   ;;  %s2353_s5 = inlined_call_operand.vmem [shape: f32[32,32], index: 5, kind: input, shape index: {}]   ;;  %s2354_s6 = inlined_call_operand.vmem [shape: f32[32,1], index: 6, kind: input, shape index: {}]   ;;  %s2355_s7 = inlined_call_operand.vmem [shape: f32[32,1], index: 7, kind: input, shape index: {}]   ;;  %s2356_s8 = inlined_call_operand.vmem [shape: f32[32,1], index: 8, kind: input, shape index: {}]   ;;  %s2357_s9 = inlined_call_operand.vmem [shape: f32[4,32], index: 9, kind: input, shape index: {}]   ;;  %s2358_s10 = inlined_call_operand.vmem [shape: f32[4,1], index: 10, kind: input, shape index: {}]   ;;  %s2359_s11 = inlined_call_operand.vmem [shape: f32[32,1], index: 11, kind: input, shape index: {}]   ;;  %s2360_s12 = inlined_call_operand.vmem [shape: f32[32,1], index: 12, kind: input, shape index: {}]   ;;  %s2361_s13 = inlined_call_operand.vmem [shape: f32[32,17], index: 13, kind: input, shape index: {}]   ;;  %s2362_s14 = inlined_call_operand.vmem [shape: f32[32,1], index: 14, kind: input, shape index: {}]   ;;  %s2363_s15 = inlined_call_operand.vmem [shape: f32[4,32], index: 15, kind: input, shape index: {}]   ;;  %s2364_s16 = inlined_call_operand.vmem [shape: f32[4,1], index: 16, kind: input, shape index: {}]   ;;  %s2365_s17 = inlined_call_operand.hbm [shape: f32[2,1,8], index: 17, kind: output, shape index: {0}]   ;;  %s2366_s18 = inlined_call_operand.vmem [shape: f32[2,4,1], index: 18, kind: output, shape index: {1}]  }
   0x1   :  { %2371 = sst [smem:[#allocation11_spill]] %s2348_s0 }
   0x2   :  { %2372 = sst [smem:[#allocation12_spill]] %s2349_s1 }
   0x3   :  { %2373 = sst [smem:[#allocation13_spill]] %s2350_s2 }
   0x4   :  { %2374 = sst [smem:[#allocation14_spill]] %s2351_s3 }
   0x5   :  { %2375 = sst [smem:[#allocation15_spill]] %s2352_s4 }
   0x6   :  { %2376 = sst [smem:[#allocation16_spill]] %s2361_s13 }
   0x7   :  { %24 = vsyncpa [#allocation4], 0 }
   0x8   :  { %26 = vsyncpa [#allocation4 + $0x1], 0  ;;  %s2056_s27 = smov 0   ;;  %s2058_s28 = smov 0  }
   0x9   :  { %s2060_s29 = smov 0   ;;  %s2062_s30 = smov 0  }
   0xa   :  { %s2064_s0 = smov 0   ;;  %s2066_s19 = smov 0  }
   0xb LB: > { %2377 = sst [smem:[#allocation6_spill]] %s1942_s29  ;;  %s1628_s1 = sadd.s32 4294967295, %s1954_s19   ;;  %s1954_s19 = sphi %s2066_s19, %s32_s19   ;;  %s1950_s0 = sphi %s2064_s0, %s2394_s0   ;;  %s1946_s30 = sphi %s2062_s30, %s2393_s30   ;;  %s1942_s29 = sphi %s2060_s29, %s2392_s29   ;;  %s1938_s28 = sphi %s2058_s28, %s2396_s28   ;;  %s1934_s27 = sphi %s2056_s27, %s2395_s27  }
   0xc   : > { %2378 = sst [smem:[#allocation7_spill]] %s1950_s0  ;;  %s1629_s20 = sadd.s32 4294967294, %s1954_s19  }
   0xd   : > { %s44_s21 = sadd.s32 1, %s1950_s0  ;;  %s427_s22 = sadd.s32 1, %s1942_s29 }
   0xe   : > { %p46_p0 = scmp.ge.s32.totalorder %s44_s21, 2  ;;  %p437_p1 = scmp.ne.s32.totalorder %s1942_s29, %s1938_s28 }
   0xf   : > { %p438_p2 = scmp.eq.s32.totalorder %s1628_s1, 1  ;;  %p443_p3 = scmp.ne.s32.totalorder %s1938_s28, %s1934_s27 }
  0x10   : > { %s2398_s21 = smov (%p46_p0, %s44_s21), 0  ;;  %p444_p5 = scmp.eq.s32.totalorder %s1629_s20, 1 }
  0x11   : > { %2379 = sst [smem:[#allocation8_spill]] %s2398_s21  ;;  %p2096_p4 = por %p438_p2, %p437_p1 }
  0x12   : > { %s422_s23 = ssub.s32 %s1950_s0, %s2398_s21  ;;  %p1632_p6 = scmp.ge.s32.totalorder %s1954_s19, 1 }
  0x13   : > { %p425_p7 = scmp.eq.s32.totalorder %s422_s23, 0  ;;  %p2103_p8 = por %p444_p5, %p443_p3 }
  0x14   : > { %p556_p9 = scmp.lt.s32.totalorder %s1954_s19, 3 }
  0x15   : > { %s2381_s24 = scalar_select %p2103_p8, 1, 0 }
  0x16   : > { %s2109_s25 = scalar_select %p425_p7, %s1942_s29, %s427_s22  }
  0x17   : > { %2382 = sst [smem:[#allocation9_spill]] %s2381_s24  ;;  %p557_p10 = pnand %p1632_p6, %p556_p9 }
  0x18   : > { %2383 = sst [smem:[#allocation10_spill]] %s2109_s25  ;;  %p625_p11 = scmp.lt.s32.totalorder (!%p557_p10), %s1946_s30, 1  ;;  %vm661_vm0 = vcmask (!%p557_p10), 138240   ;;  %vm674_vm1 = vcmask (!%p557_p10), 1040384   ;;  %v1956_v8 = vmov (!%p557_p10), 0.0|0.0   ;;  %vm1957_vm2 = vmmov (!%p557_p10), 0  }
  0x19   : > { %560 = sbr.rel (%p557_p10) target bundleno = 1166 (0x48e), region = 88  ;;  %s2384_s13 = sld [smem:[#allocation16_spill]] (!%p557_p10)  ;;  %1762 = vmatprep.subr.bf16.mxu1 (!%p557_p10), %v1956_v8  ;;  %v1958_v9 = vmov (!%p557_p10), 0.0   ;;  %v1959_v12 = vmov (!%p557_p10), 0   ;;  %v1080_v15 = vld [vmem:[%s2355_s7] sm:$0xff] (!%p557_p10)  ;;  %v1081_v16 = vld [vmem:[%s2355_s7 + $0x8] sm:$0xff] (!%p557_p10) }
  0x1a   : > { %s2385_s22 = sld [smem:[#allocation12_spill]] (!%p557_p10)  ;;  %1720 = vmatprep.mubr.msk.f32.mxu1 (!%p557_p10), %vm1957_vm2, %v1958_v9  ;;  %s2386_s4 = sld [smem:[#allocation15_spill]] (!%p557_p10)  ;;  %1846 = vset.pattern.permute.xlu0 (!%p557_p10), %v1959_v12  ;;  %v1108_v17 = vld [vmem:[%s2356_s8] sm:$0xff] (!%p557_p10)  ;;  %v1109_v18 = vld [vmem:[%s2356_s8 + $0x8] sm:$0xff] (!%p557_p10)  ;;  %v1082_v19 = vld [vmem:[%s2355_s7 + $0x10] sm:$0xff] (!%p557_p10)  ;;  %vm797_vm7 = vcmask (!%p557_p10), 261120  }
  0x1b   : > { %1847 = vset.pattern.permute.xlu1 (!%p557_p10), %v1959_v12  ;;  %v1083_v20 = vld [vmem:[%s2355_s7 + $0x18] sm:$0xff] (!%p557_p10)  ;;  %v1110_v21 = vld [vmem:[%s2356_s8 + $0x10] sm:$0xff] (!%p557_p10)  ;;  %v1140_v23 = vld [vmem:[%s2354_s6] sm:$0xff] (!%p557_p10)  ;;  %s2388_s3 = sld [smem:[#allocation14_spill]] (!%p557_p10)  ;;  %vm906_vm8 = vcmask (!%p557_p10), 130048   ;;  %vm871_vm9 = vcmask (!%p557_p10), 3072  }
  0x1c   : > { %v1111_v22 = vld [vmem:[%s2356_s8 + $0x18] sm:$0xff] (!%p557_p10)  ;;  %v1141_v24 = vld [vmem:[%s2354_s6 + $0x8] sm:$0xff] (!%p557_p10)  ;;  %v1142_v25 = vld [vmem:[%s2354_s6 + $0x10] sm:$0xff] (!%p557_p10)  ;;  %vm1036_vm11 = vcmask (!%p557_p10), 64512  }
  0x1d   : > { %v1143_v26 = vld [vmem:[%s2354_s6 + $0x18] sm:$0xff] (!%p557_p10)  ;;  %v1336_v27 = vld [vmem:[%s2359_s11] sm:$0xff] (!%p557_p10)  ;;  %v1337_v28 = vld [vmem:[%s2359_s11 + $0x8] sm:$0xff] (!%p557_p10) }
  0x1e   : > { %v1364_v29 = vld [vmem:[%s2360_s12] sm:$0xff] (!%p557_p10)  ;;  %v1365_v30 = vld [vmem:[%s2360_s12 + $0x8] sm:$0xff] (!%p557_p10)  ;;  %v1338_v31 = vld [vmem:[%s2359_s11 + $0x10] sm:$0xff] (!%p557_p10) }
  0x1f   : > { %v653_v0 = vld [vmem:[%s2384_s13] sm:$0xff] (!%p557_p10)  ;;  %v654_v5 = vld [vmem:[%s2384_s13 + $0x8] sm:$0xff] (!%p557_p10)  ;;  %v655_v6 = vld [vmem:[%s2384_s13 + $0x10] sm:$0xff] (!%p557_p10) }
  0x20   : > { %1706 = vmatprep.mubr.msk.f32.mxu0 %vm661_vm0, %v653_v0  ;;  %s2117_s20 = scalar_select %p625_p11, %s1946_s30, 1  ;;  %v656_v7 = vld [vmem:[%s2384_s13 + $0x18] sm:$0xff]  ;;  %v882_v10 = vld [vmem:[%s2386_s4] sm:$0xff]  ;;  %v884_v11 = vld [vmem:[%s2386_s4 + $0x10] sm:$0xff] }
  0x21   : > { %888 = vperm.xlu0 %1846, %v882_v10   ;;  %898 = vperm.xlu1 %1847, %v884_v11   ;;  %v883_v13 = vld [vmem:[%s2386_s4 + $0x8] sm:$0xff]  ;;  %v885_v14 = vld [vmem:[%s2386_s4 + $0x18] sm:$0xff]  ;;  %v1366_v33 = vld [vmem:[%s2360_s12 + $0x10] sm:$0xff] }
  0x22   : > { %s1786_s23 = smul.u32 24, %s2117_s20  ;;  %v1339_v32 = vld [vmem:[%s2359_s11 + $0x18] sm:$0xff]  ;;  %v1393_v35 = vld [vmem:[%s2358_s10] sm:$0xf]  ;;  %v658_v36 = vld [vmem:[%s2362_s14 + $0x8] sm:$0xff]  ;;  %s1668_s21 = sshll.u32 %s2117_s20, 4 }
  0x23   : > { %v1367_v34 = vld [vmem:[%s2360_s12 + $0x18] sm:$0xff]  ;;  %v657_v37 = vld [vmem:[%s2362_s14] sm:$0xff]  ;;  %v659_v44 = vld [vmem:[%s2362_s14 + $0x10] sm:$0xff]  ;;  %s1636_s26 = sshll.u32 %s2117_s20, 2 }
  0x24   : > { %s637_s25 = scalar_lea.vmem %s2385_s22, %s1786_s23  ;;  %v660_v42 = vld [vmem:[%s2362_s14 + $0x18] sm:$0xff] }
  0x25   : > { %v650_v1 = vld [vmem:[%s637_s25] sm:$0xff]  ;;  %v651_v2 = vld [vmem:[%s637_s25 + $0x8] sm:$0xff]  ;;  %v652_v4 = vld [vmem:[%s637_s25 + $0x10] sm:$0x1]  ;;  %893 = vperm.xlu0 %1846, %v883_v13   ;;  %903 = vperm.xlu1 %1847, %v885_v14   ;;  %s2387_s25 = sld [smem:[#allocation11_spill]] }
  0x26   : > { %v1758_v3 = vpack.c.bf16 %v651_v2, %v650_v1 }
  0x28   : > { %1759 = vmatprep.subr.bf16.mxu0 %v1758_v3 }
  0x29   : > { %1761 = vmatpush3.bf16.msra.mxu0 %v1758_v3  ;;  %1086 = vperm.xlu0 %1846, %v1080_v15  }
  0x2a   : > { %1704 = vmatprep.subr.msk.mxu0 %vm674_vm1, %v652_v4  ;;  %1091 = vperm.xlu1 %1847, %v1081_v16  }
  0x2b   : > { %s632_s13 = scalar_lea.vmem %s2387_s25, %s1668_s21  ;;  %s2389_s21 = sld [smem:[#allocation13_spill]] }
  0x2c   : > { %v876_v12 = vld [vmem:[%s632_s13] sm:$0xff]  ;;  %v877_v13 = vld [vmem:[%s632_s13 + $0x8] sm:$0xff] }
  0x2d   : > { %1705 = vmatpush3.msk.msra.mxu0 %vm674_vm1, %v652_v4  ;;  %1114 = vperm.xlu0 %1846, %v1108_v17   ;;  %v1768_v17 = vpack.c.bf16 %v877_v13, %v876_v12 }
  0x2e   : > { %1707 = vmatmul.mubr.msk.f32.vlgmr.msra.gmra.mrb[0].mxu0 %vm661_vm0, %v654_v5  ;;  %1119 = vperm.xlu1 %1847, %v1109_v18  }
  0x2f   : > { %1709 = vmatprep.mubr.msk.f32.mxu0 %vm661_vm0, %v655_v6 }
  0x31   : > { %1096 = vperm.xlu0 %1846, %v1082_v19   ;;  %v795_v19 = vld [vmem:[%s2363_s15] sm:$0xf]  ;;  %s641_s29 = scalar_lea.vmem %s2389_s21, %s1636_s26  ;;  %s617_s21 = sand.u32 1, %s1938_s28  }
  0x32   : > { %1710 = vmatmul.mubr.msk.f32.gmra.mrb[2].mxu0 %vm661_vm0, %v656_v7  ;;  %1101 = vperm.xlu1 %1847, %v1083_v20   ;;  %v878_v20 = vld [vmem:[%s2388_s3] sm:$0xff]  ;;  %s618_s24 = scalar_lea.vmem [#allocation3], %s617_s21  ;;  %s1490_s20 = scalar_lea.sflag [#allocation4], %s617_s21 }
  0x33   : > { %s1507_s25 = sshll.u32 %s618_s24, 4  ;;  %s2303_s25 = int_to_ptr.vmem [resolvable:$true] %s1507_s25 }
  0x34   : > { %s1876_s23 = scalar_lea.vmem %s2303_s25, 16 }
  0x35   : > { %1124 = vperm.xlu0 %1846, %v1110_v21   ;;  %v879_v21 = vld [vmem:[%s2388_s3 + $0x8] sm:$0xff]  ;;  %p1877_p12 = scmp.ne.s32.totalorder %s2303_s25, %s1876_s23 }
  0x36   : > { %1129 = vperm.xlu1 %1847, %v1111_v22   ;;  %v880_v22 = vld [vmem:[%s2388_s3 + $0x10] sm:$0xff] }
  0x37   : > { %p1878_p13 = pnand %p1877_p12, %p2096_p4 }
  0x39   : > { %1146 = vperm.xlu0 %1846, %v1140_v23   ;;  %v881_v23 = vld [vmem:[%s2388_s3 + $0x18] sm:$0xff]  ;;  %s645_s3 = scalar_lea.vmem %s2366_s18, %s1636_s26  ;;  %p1879_p0 = pneg %p1878_p13 }
  0x3a   : > { %1151 = vperm.xlu1 %1847, %v1141_v24   ;;  %v1136_v24 = vld [vmem:[%s2353_s5] sm:$0xff] }
  0x3b   : > { %1741 = vmatprep.mubr.msk.f32.mxu0 %vm797_vm7, %v1136_v24 }
  0x3d   : > { %1156 = vperm.xlu0 %1846, %v1142_v25  }
  0x3e   : > { %1161 = vperm.xlu1 %1847, %v1143_v26   ;;  %v796_v26 = vld [vmem:[%s2364_s16] sm:$0xf] }
  0x41   : > { %1342 = vperm.xlu0 %1846, %v1336_v27   ;;  %v873_v27 = vld [vmem:[%s641_s29] sm:$0xf]  ;;  %s1665_s29 = sshll.u32 %s1946_s30, 4  ;;  %s1960_s30 = smov [#allocation3]  }
  0x42   : > { %1347 = vperm.xlu1 %1847, %v1337_v28   ;;  %s2301_s4 = scalar_lea.hbm %s2365_s17, %s1665_s29  ;;  %s1880_s22 = sshll.u32 %s1960_s30, 4  ;;  %s1881_s22 = int_to_ptr.vmem [resolvable:$false] %s1880_s22 }
  0x43   : > { %s1882_s26 = scalar_lea.vmem %s1881_s22, 32  ;;  %p1883_p1 = scmp.lt.s32.totalorder %s2303_s25, %s1881_s22 }
  0x44   : > { %p1884_p2 = scmp.lt.s32.totalorder %s1882_s26, %s1876_s23 }
  0x45   : > { %1370 = vperm.xlu0 %1846, %v1364_v29  }
  0x46   : > { %1375 = vperm.xlu1 %1847, %v1365_v30   ;;  %p1885_p3 = por %p1884_p2, %p1883_p1 }
  0x48   : > { %p1886_p5 = pnand %p1885_p3, %p1879_p0 }
  0x49   : > { %1352 = vperm.xlu0 %1846, %v1338_v31  }
  0x4a   : > { %1357 = vperm.xlu1 %1847, %v1339_v32  }
  0x4d   : > { %1380 = vperm.xlu0 %1846, %v1366_v33  }
  0x4e   : > { %1385 = vperm.xlu1 %1847, %v1367_v34  }
  0x51   : > { %1396 = vperm.xlu0 %1846, %v1393_v35  }
  0xa0   : > { %v889_v25 = vpop.permute.xlu0 %888  ;;  %v899_v30 = vpop.permute.xlu1 %898 }
  0xa4   : > { %v894_v32 = vpop.permute.xlu0 %893 }
 0x101   : > { %v1708_v38 = vpop.f32.mrb[0].mxu0 }
 0x102   : > { %v750_v39 = vadd.f32 %v1708_v38, %v658_v36  ;;  %v744_v40 = vpop.f32.mrb[1].mxu0  ;;  %v904_v38 = vpop.permute.xlu1 %903 }
 0x103   : > { %v745_v41 = vadd.f32 %v744_v40, %v657_v37 }
 0x104   : > { %v768_v43 = vmin.f32 %v750_v39, 0.0  ;;  %vm764_vm3 = vcmp.gt.f32.partialorder %v750_v39, 0.0 }
 0x105   : > { %v767_v45 = vmin.f32 %v745_v41, 0.0  ;;  %v1711_v46 = vpop.f32.mrb[2].mxu0  ;;  %vm763_vm4 = vcmp.gt.f32.partialorder %v745_v41, 0.0 }
 0x106   : > { %v773_v47 = vmul.f32 1.442695, %v768_v43  ;;  %v760_v48 = vadd.f32 %v1711_v46, %v660_v42  ;;  %v754_v49 = vpop.f32.mrb[3].mxu0 }
 0x107   : > { %v771_v50 = vmul.f32 1.442695, %v767_v45  ;;  %v755_v51 = vadd.f32 %v754_v49, %v659_v44 }
 0x108   : > { %1848 = vpow2.f32 %v773_v47  ;;  %v770_v52 = vmin.f32 %v760_v48, 0.0  ;;  %vm766_vm5 = vcmp.gt.f32.partialorder %v760_v48, 0.0 }
 0x109   : > { %1850 = vpow2.f32 %v771_v50  ;;  %v769_v53 = vmin.f32 %v755_v51, 0.0  ;;  %vm765_vm6 = vcmp.gt.f32.partialorder %v755_v51, 0.0 }
 0x10a   : > { %v777_v54 = vmul.f32 1.442695, %v770_v52 }
 0x10b   : > { %v775_v55 = vmul.f32 1.442695, %v769_v53 }
 0x10c   : > { %1852 = vpow2.f32 %v777_v54 }
 0x10d   : > { %1854 = vpow2.f32 %v775_v55 }
 0x112   : > { %v1849_v56 = vpop.eup %1848 }
 0x113   : > { %v1851_v57 = vpop.eup %1850  ;;  %v1644_v58 = vadd.f32 -1.0, %v1849_v56 }
 0x114   : > { %v1643_v59 = vadd.f32 -1.0, %v1851_v57 }
 0x115   : > { %v784_v60 = vmul.f32 1.6732632, %v1644_v58 }
 0x116   : > { %v1853_v61 = vpop.eup %1852  ;;  %v783_v62 = vmul.f32 1.6732632, %v1643_v59 }
 0x117   : > { %v1855_v63 = vpop.eup %1854  ;;  %v1646_v0 = vadd.f32 -1.0, %v1853_v61  ;;  %v788_v1 = vsel %vm764_vm3, %v750_v39, %v784_v60  ;;  %vm1479_vm3 = vcmask 60416  }
 0x118   : > { %v1645_v2 = vadd.f32 -1.0, %v1855_v63  ;;  %v787_v3 = vsel %vm763_vm4, %v745_v41, %v783_v62  ;;  %v792_v4 = vmul.f32 1.050701, %v788_v1  ;;  %vm1487_vm4 = vcmask 57344  }
 0x119   : > { %v786_v5 = vmul.f32 1.6732632, %v1646_v0  ;;  %v791_v6 = vmul.f32 1.050701, %v787_v3 }
 0x11a   : > { %v785_v7 = vmul.f32 1.6732632, %v1645_v2 }
 0x11b   : > { %v790_v10 = vsel %vm766_vm5, %v760_v48, %v786_v5  ;;  %v1763_v11 = vpack.c.bf16 %v792_v4, %v791_v6 }
 0x11c   : > { %v794_v14 = vmul.f32 1.050701, %v790_v10  ;;  %v789_v15 = vsel %vm765_vm6, %v755_v51, %v785_v7 }
 0x11d   : > { %v793_v16 = vmul.f32 1.050701, %v789_v15  ;;  %1764 = vmatpush3.bf16.msra.mxu1 %v1763_v11 }
 0x11e   : > { %1765 = vmatprep.subr.bf16.mxu1 %v1956_v8 }
 0x11f   : > { %v1766_v18 = vpack.c.bf16 %v794_v14, %v793_v16 }
 0x121   : > { %1767 = vmatpush3.bf16.msra.mxu1 %v1766_v18 }
 0x122   : > { %1769 = vmatprep.subr.bf16.mxu1 %v1768_v17 }
 0x124   : > { %1721 = vmatmul.mubr.msk.f32.vlgmr.msra.gmra.mrb[0].mxu1 %vm797_vm7, %v795_v19 }
 0x125   : > { %1771 = vmatpush3.bf16.msra.mxu1 %v1768_v17  ;;  %1727 = vmatprep.mubr.msk.f32.mxu1 %vm906_vm8, %v878_v20 }
 0x126   : > { %1780 = vmatprep.subr.bf16.mxu1 %v1956_v8 }
 0x128   : > { %1728 = vmatmul.mubr.msk.f32.vlgmr.msra.gmra.mrb[2].mxu1 %vm906_vm8, %v879_v21 }
 0x129   : > { %1730 = vmatprep.mubr.msk.f32.mxu1 %vm906_vm8, %v880_v22 }
 0x12c   : > { %1731 = vmatmul.mubr.msk.f32.gmra.mrb[4].mxu1 %vm906_vm8, %v881_v23 }
 0x12d   : > { %1755 = vmatprep.mubr.msk.f32.mxu1 %vm1957_vm2, %v1958_v9 }
 0x1f7   : > { %v867_v9 = vpop.f32.mrb[0].mxu1 }
 0x1f8   : > { %v868_v28 = vadd.f32 %v867_v9, %v796_v26  ;;  %v1722_v29 = vpop.f32.mrb[1].mxu1 }
 0x1fa   : > { %872 = vst.msk [vmem:[%s645_s3] sm:$0xf] %vm871_vm9, %v868_v28  ;;  %v874_v31 = vmul.f32 %v873_v27, %v868_v28 }
 0x1fb   : > { %v1729_v33 = vpop.f32.mrb[2].mxu1 }
 0x1fc   : > { %875 = vst.msk [vmem:[#allocation2] sm:$0xf] %vm871_vm9, %v874_v31  ;;  %v991_v34 = vadd.f32 %v1729_v33, %v894_v32  ;;  %v985_v35 = vpop.f32.mrb[3].mxu1 }
 0x1fd   : > { %v986_v36 = vadd.f32 %v985_v35, %v889_v25 }
 0x1fe   : > { %v1009_v37 = vmin.f32 %v991_v34, 0.0  ;;  %vm1005_vm10 = vcmp.gt.f32.partialorder %v991_v34, 0.0 }
 0x1ff   : > { %v1008_v39 = vmin.f32 %v986_v36, 0.0  ;;  %v1732_v40 = vpop.f32.mrb[4].mxu1  ;;  %vm1004_vm12 = vcmp.gt.f32.partialorder %v986_v36, 0.0 }
 0x200   : > { %v1014_v41 = vmul.f32 1.442695, %v1009_v37  ;;  %v1001_v42 = vadd.f32 %v1732_v40, %v904_v38  ;;  %v995_v43 = vpop.f32.mrb[5].mxu1 }
 0x201   : > { %v1012_v44 = vmul.f32 1.442695, %v1008_v39  ;;  %v996_v45 = vadd.f32 %v995_v43, %v899_v30  ;;  %v1087_v43 = vpop.permute.xlu0 %1086 }
 0x202   : > { %1856 = vpow2.f32 %v1014_v41  ;;  %v1011_v46 = vmin.f32 %v1001_v42, 0.0  ;;  %vm1007_vm13 = vcmp.gt.f32.partialorder %v1001_v42, 0.0 }
 0x203   : > { %1858 = vpow2.f32 %v1012_v44  ;;  %v1010_v47 = vmin.f32 %v996_v45, 0.0  ;;  %v1472_v48 = vld [vmem:[#allocation2] sm:$0xf]  ;;  %vm1006_vm14 = vcmp.gt.f32.partialorder %v996_v45, 0.0  ;;  %v1092_v44 = vpop.permute.xlu1 %1091 }
 0x204   : > { %v1018_v49 = vmul.f32 1.442695, %v1011_v46  ;;  %1475 = vperm.xlu1 %1847, %v1472_v48  }
 0x205   : > { %v1016_v50 = vmul.f32 1.442695, %v1010_v47  ;;  %v1115_v47 = vpop.permute.xlu0 %1114 }
 0x206   : > { %1860 = vpow2.f32 %v1018_v49 }
 0x207   : > { %1862 = vpow2.f32 %v1016_v50  ;;  %v1120_v48 = vpop.permute.xlu1 %1119 }
 0x209   : > { %v1097_v49 = vpop.permute.xlu0 %1096 }
 0x20b   : > { %v1102_v50 = vpop.permute.xlu1 %1101 }
 0x20c   : > { %v1857_v51 = vpop.eup %1856 }
 0x20d   : > { %v1859_v52 = vpop.eup %1858  ;;  %v1653_v53 = vadd.f32 -1.0, %v1857_v51 }
 0x20e   : > { %v1652_v54 = vadd.f32 -1.0, %v1859_v52 }
 0x20f   : > { %v1025_v55 = vmul.f32 1.6732632, %v1653_v53 }
 0x210   : > { %v1861_v56 = vpop.eup %1860  ;;  %v1024_v57 = vmul.f32 1.6732632, %v1652_v54 }
 0x211   : > { %v1863_v58 = vpop.eup %1862  ;;  %v1029_v59 = vsel %vm1005_vm10, %v991_v34, %v1025_v55  ;;  %v1655_v60 = vadd.f32 -1.0, %v1861_v56 }
 0x212   : > { %v1033_v61 = vmul.f32 1.050701, %v1029_v59  ;;  %v1028_v62 = vsel %vm1004_vm12, %v986_v36, %v1024_v57  ;;  %v1654_v63 = vadd.f32 -1.0, %v1863_v58 }
 0x213   : > { %v1032_v0 = vmul.f32 1.050701, %v1028_v62  ;;  %v1027_v1 = vmul.f32 1.6732632, %v1655_v60  ;;  %v1125_v60 = vpop.permute.xlu0 %1124 }
 0x214   : > { %v1038_v2 = vsel %vm1036_vm11, %v1033_v61, 0.0  ;;  %v1026_v3 = vmul.f32 1.6732632, %v1654_v63 }
 0x215   : > { %v1037_v4 = vsel %vm1036_vm11, %v1032_v0, 0.0  ;;  %v1031_v5 = vsel %vm1007_vm13, %v1001_v42, %v1027_v1 }
 0x216   : > { %v1039_v6 = vadd.f32 %v1038_v2, %v1037_v4  ;;  %v1030_v7 = vsel %vm1006_vm14, %v996_v45, %v1026_v3  ;;  %v1035_v10 = vmul.f32 1.050701, %v1031_v5  ;;  %v1137_v4 = vld [vmem:[%s2353_s5 + $0x8] sm:$0xff]  ;;  %v1138_v5 = vld [vmem:[%s2353_s5 + $0x10] sm:$0xff] }
 0x217   : > { %v1034_v11 = vmul.f32 1.050701, %v1030_v7 }
 0x218   : > { %v1042_v14 = vsel %vm1036_vm11, %v1035_v10, 0.0 }
 0x219   : > { %v1040_v12 = vsel %vm1036_vm11, %v1034_v11, 0.0 }
 0x21a   : > { %v1041_v13 = vadd.f32 %v1040_v12, %v1039_v6  ;;  %v1139_v6 = vld [vmem:[%s2353_s5 + $0x18] sm:$0xff] }
 0x21c   : > { %v1043_v15 = vadd.f32 %v1042_v14, %v1041_v13 }
 0x21e   : > { %v1044_v16 = vrot.slane %v1043_v15, 4 }
 0x220   : > { %v1045_v17 = vadd.f32 %v1044_v16, %v1043_v15 }
 0x222   : > { %v1046_v18 = vrot.slane %v1045_v17, 2 }
 0x224   : > { %v1047_v19 = vadd.f32 %v1046_v18, %v1045_v17 }
 0x226   : > { %v1048_v20 = vrot.slane %v1047_v19, 1 }
 0x228   : > { %v1049_v21 = vadd.f32 %v1048_v20, %v1047_v19 }
 0x22a   : > { %v1051_v22 = vmul.f32 0.03125, %v1049_v21 }
 0x22c   : > { %v1052_v23 = vsub.f32 %v1032_v0, %v1051_v22  ;;  %v1053_v24 = vsub.f32 %v1033_v61, %v1051_v22  ;;  %v1054_v25 = vsub.f32 %v1034_v11, %v1051_v22  ;;  %v1055_v26 = vsub.f32 %v1035_v10, %v1051_v22  ;;  %v1130_v61 = vpop.permute.xlu1 %1129  ;;  %v1147_v10 = vpop.permute.xlu0 %1146 }
 0x22e   : > { %v1056_v9 = vmul.f32 %v1052_v23, %v1052_v23  ;;  %v1057_v27 = vmul.f32 %v1053_v24, %v1053_v24  ;;  %v1058_v28 = vmul.f32 %v1054_v25, %v1054_v25  ;;  %v1059_v29 = vmul.f32 %v1055_v26, %v1055_v26 }
 0x230   : > { %v1060_v30 = vsel %vm1036_vm11, %v1056_v9, 0.0  ;;  %v1061_v31 = vsel %vm1036_vm11, %v1057_v27, 0.0  ;;  %v1063_v33 = vsel %vm1036_vm11, %v1058_v28, 0.0  ;;  %v1065_v35 = vsel %vm1036_vm11, %v1059_v29, 0.0  ;;  %v1152_v7 = vpop.permute.xlu1 %1151  ;;  %v1157_v19 = vpop.permute.xlu0 %1156 }
 0x231   : > { %v1062_v32 = vadd.f32 %v1061_v31, %v1060_v30 }
 0x233   : > { %v1064_v34 = vadd.f32 %v1063_v33, %v1062_v32 }
 0x234   : > { %v1162_v16 = vpop.permute.xlu1 %1161 }
 0x235   : > { %v1066_v36 = vadd.f32 %v1065_v35, %v1064_v34 }
 0x237   : > { %v1067_v37 = vrot.slane %v1066_v36, 4 }
 0x239   : > { %v1068_v38 = vadd.f32 %v1067_v37, %v1066_v36 }
 0x23b   : > { %v1069_v39 = vrot.slane %v1068_v38, 2 }
 0x23d   : > { %v1070_v40 = vadd.f32 %v1069_v39, %v1068_v38 }
 0x23f   : > { %v1071_v41 = vrot.slane %v1070_v40, 1 }
 0x241   : > { %v1072_v42 = vadd.f32 %v1071_v41, %v1070_v40 }
 0x243   : > { %v1073_v45 = vmul.f32 0.03125, %v1072_v42 }
 0x245   : > { %v1074_v46 = vadd.f32 1e-05, %v1073_v45 }
 0x247   : > { %1864 = vrsqrt.f32 %v1074_v46 }
 0x251   : > { %v1865_v51 = vpop.eup %1864 }
 0x252   : > { %v1078_v52 = vmul.f32 %v1865_v51, %v1054_v25  ;;  %v1076_v53 = vmul.f32 %v1865_v51, %v1052_v23  ;;  %v1077_v54 = vmul.f32 %v1865_v51, %v1053_v24  ;;  %v1079_v55 = vmul.f32 %v1865_v51, %v1055_v26 }
 0x254   : > { %v1104_v56 = vmul.f32 %v1087_v43, %v1076_v53  ;;  %v1105_v57 = vmul.f32 %v1092_v44, %v1077_v54  ;;  %v1106_v58 = vmul.f32 %v1097_v49, %v1078_v52  ;;  %v1107_v59 = vmul.f32 %v1102_v50, %v1079_v55 }
 0x256   : > { %v1132_v62 = vadd.f32 %v1115_v47, %v1104_v56  ;;  %v1133_v63 = vadd.f32 %v1120_v48, %v1105_v57  ;;  %v1134_v0 = vadd.f32 %v1125_v60, %v1106_v58  ;;  %v1135_v1 = vadd.f32 %v1130_v61, %v1107_v59 }
 0x258   : > { %v1772_v2 = vpack.c.bf16 %v1133_v63, %v1132_v62  ;;  %v1776_v3 = vpack.c.bf16 %v1135_v1, %v1134_v0 }
 0x25a   : > { %1773 = vmatprep.subr.bf16.mxu0 %v1772_v2 }
 0x25b   : > { %1775 = vmatpush3.bf16.msra.mxu0 %v1772_v2 }
 0x25c   : > { %1777 = vmatprep.subr.bf16.mxu0 %v1776_v3 }
 0x25f   : > { %1779 = vmatpush3.bf16.msra.mxu0 %v1776_v3 }
 0x262   : > { %1742 = vmatmul.mubr.msk.f32.vlgmr.msra.gmra.mrb[4].mxu0 %vm797_vm7, %v1137_v4 }
 0x263   : > { %1744 = vmatprep.mubr.msk.f32.mxu0 %vm797_vm7, %v1138_v5 }
 0x266   : > { %1745 = vmatmul.mubr.msk.f32.gmra.mrb[6].mxu0 %vm797_vm7, %v1139_v6 }
 0x335   : > { %v1743_v11 = vpop.f32.mrb[4].mxu0 }
 0x336   : > { %v1249_v12 = vadd.f32 %v1743_v11, %v1152_v7  ;;  %v1243_v13 = vpop.f32.mrb[5].mxu0 }
 0x337   : > { %v1244_v14 = vadd.f32 %v1243_v13, %v1147_v10 }
 0x338   : > { %v1267_v15 = vmin.f32 %v1249_v12, 0.0  ;;  %vm1263_vm15 = vcmp.gt.f32.partialorder %v1249_v12, 0.0 }
 0x339   : > { %v1266_v17 = vmin.f32 %v1244_v14, 0.0  ;;  %v1746_v18 = vpop.f32.mrb[6].mxu0  ;;  %vm1262_vm0 = vcmp.gt.f32.partialorder %v1244_v14, 0.0 }
 0x33a   : > { %v1272_v20 = vmul.f32 1.442695, %v1267_v15  ;;  %v1259_v21 = vadd.f32 %v1746_v18, %v1162_v16  ;;  %v1253_v22 = vpop.f32.mrb[7].mxu0 }
 0x33b   : > { %v1270_v23 = vmul.f32 1.442695, %v1266_v17  ;;  %v1254_v24 = vadd.f32 %v1253_v22, %v1157_v19  ;;  %v1348_v22 = vpop.permute.xlu1 %1347 }
 0x33c   : > { %1866 = vpow2.f32 %v1272_v20  ;;  %v1269_v25 = vmin.f32 %v1259_v21, 0.0  ;;  %vm1265_vm1 = vcmp.gt.f32.partialorder %v1259_v21, 0.0 }
 0x33d   : > { %1868 = vpow2.f32 %v1270_v23  ;;  %v1268_v26 = vmin.f32 %v1254_v24, 0.0  ;;  %vm1264_vm2 = vcmp.gt.f32.partialorder %v1254_v24, 0.0 }
 0x33e   : > { %v1276_v9 = vmul.f32 1.442695, %v1269_v25 }
 0x33f   : > { %v1274_v27 = vmul.f32 1.442695, %v1268_v26  ;;  %v1376_v26 = vpop.permute.xlu1 %1375 }
 0x340   : > { %1870 = vpow2.f32 %v1276_v9 }
 0x341   : > { %1872 = vpow2.f32 %v1274_v27 }
 0x343   : > { %v1358_v27 = vpop.permute.xlu1 %1357 }
 0x346   : > { %v1867_v28 = vpop.eup %1866 }
 0x347   : > { %v1869_v29 = vpop.eup %1868  ;;  %v1661_v30 = vadd.f32 -1.0, %v1867_v28 }
 0x348   : > { %v1660_v31 = vadd.f32 -1.0, %v1869_v29 }
 0x349   : > { %v1283_v32 = vmul.f32 1.6732632, %v1661_v30 }
 0x34a   : > { %v1871_v33 = vpop.eup %1870  ;;  %v1282_v34 = vmul.f32 1.6732632, %v1660_v31 }
 0x34b   : > { %v1873_v35 = vpop.eup %1872  ;;  %v1287_v36 = vsel %vm1263_vm15, %v1249_v12, %v1283_v32  ;;  %v1663_v37 = vadd.f32 -1.0, %v1871_v33 }
 0x34c   : > { %v1291_v38 = vmul.f32 1.050701, %v1287_v36  ;;  %v1286_v39 = vsel %vm1262_vm0, %v1244_v14, %v1282_v34  ;;  %v1662_v40 = vadd.f32 -1.0, %v1873_v35 }
 0x34d   : > { %v1290_v41 = vmul.f32 1.050701, %v1286_v39  ;;  %v1285_v42 = vmul.f32 1.6732632, %v1663_v37 }
 0x34e   : > { %v1295_v43 = vsel %vm1036_vm11, %v1291_v38, 0.0  ;;  %v1284_v44 = vmul.f32 1.6732632, %v1662_v40 }
 0x34f   : > { %v1294_v45 = vsel %vm1036_vm11, %v1290_v41, 0.0  ;;  %v1289_v46 = vsel %vm1265_vm1, %v1259_v21, %v1285_v42  ;;  %v1343_v21 = vpop.permute.xlu0 %1342 }
 0x350   : > { %v1296_v47 = vadd.f32 %v1295_v43, %v1294_v45  ;;  %v1288_v48 = vsel %vm1264_vm2, %v1254_v24, %v1284_v44  ;;  %v1293_v49 = vmul.f32 1.050701, %v1289_v46  ;;  %v1392_v45 = vld [vmem:[%s2357_s9] sm:$0xf] }
 0x351   : > { %v1292_v50 = vmul.f32 1.050701, %v1288_v48 }
 0x352   : > { %v1299_v53 = vsel %vm1036_vm11, %v1293_v49, 0.0 }
 0x353   : > { %v1297_v51 = vsel %vm1036_vm11, %v1292_v50, 0.0  ;;  %v1371_v25 = vpop.permute.xlu0 %1370 }
 0x354   : > { %v1298_v52 = vadd.f32 %v1297_v51, %v1296_v47 }
 0x356   : > { %v1300_v54 = vadd.f32 %v1299_v53, %v1298_v52 }
 0x357   : > { %v1353_v9 = vpop.permute.xlu0 %1352 }
 0x358   : > { %v1301_v55 = vrot.slane %v1300_v54, 4 }
 0x35a   : > { %v1302_v56 = vadd.f32 %v1301_v55, %v1300_v54 }
 0x35b   : > { %v1381_v37 = vpop.permute.xlu0 %1380 }
 0x35c   : > { %v1303_v57 = vrot.slane %v1302_v56, 2 }
 0x35e   : > { %v1304_v58 = vadd.f32 %v1303_v57, %v1302_v56 }
 0x35f   : > { %v1397_v46 = vpop.permute.xlu0 %1396 }
 0x360   : > { %v1305_v59 = vrot.slane %v1304_v58, 1 }
 0x362   : > { %v1306_v60 = vadd.f32 %v1305_v59, %v1304_v58 }
 0x364   : > { %v1307_v61 = vmul.f32 0.03125, %v1306_v60 }
 0x366   : > { %v1308_v62 = vsub.f32 %v1290_v41, %v1307_v61  ;;  %v1309_v63 = vsub.f32 %v1291_v38, %v1307_v61  ;;  %v1310_v0 = vsub.f32 %v1292_v50, %v1307_v61  ;;  %v1311_v1 = vsub.f32 %v1293_v49, %v1307_v61  ;;  %v1386_v38 = vpop.permute.xlu1 %1385 }
 0x368   : > { %v1312_v2 = vmul.f32 %v1308_v62, %v1308_v62  ;;  %v1313_v3 = vmul.f32 %v1309_v63, %v1309_v63  ;;  %v1314_v4 = vmul.f32 %v1310_v0, %v1310_v0  ;;  %v1315_v5 = vmul.f32 %v1311_v1, %v1311_v1 }
 0x36a   : > { %v1316_v6 = vsel %vm1036_vm11, %v1312_v2, 0.0  ;;  %v1317_v7 = vsel %vm1036_vm11, %v1313_v3, 0.0  ;;  %v1319_v11 = vsel %vm1036_vm11, %v1314_v4, 0.0  ;;  %v1321_v13 = vsel %vm1036_vm11, %v1315_v5, 0.0  ;;  %v1476_v50 = vpop.permute.xlu1 %1475 }
 0x36b   : > { %v1318_v10 = vadd.f32 %v1317_v7, %v1316_v6 }
 0x36d   : > { %v1320_v12 = vadd.f32 %v1319_v11, %v1318_v10 }
 0x36f   : > { %v1322_v14 = vadd.f32 %v1321_v13, %v1320_v12 }
 0x371   : > { %v1323_v15 = vrot.slane %v1322_v14, 4 }
 0x373   : > { %v1324_v16 = vadd.f32 %v1323_v15, %v1322_v14 }
 0x375   : > { %v1325_v17 = vrot.slane %v1324_v16, 2 }
 0x377   : > { %v1326_v18 = vadd.f32 %v1325_v17, %v1324_v16 }
 0x379   : > { %v1327_v19 = vrot.slane %v1326_v18, 1 }
 0x37b   : > { %v1328_v20 = vadd.f32 %v1327_v19, %v1326_v18 }
 0x37d   : > { %v1329_v23 = vmul.f32 0.03125, %v1328_v20 }
 0x37f   : > { %v1330_v24 = vadd.f32 1e-05, %v1329_v23 }
 0x381   : > { %1874 = vrsqrt.f32 %v1330_v24 }
 0x38b   : > { %v1875_v28 = vpop.eup %1874 }
 0x38c   : > { %v1334_v29 = vmul.f32 %v1875_v28, %v1310_v0  ;;  %v1332_v30 = vmul.f32 %v1875_v28, %v1308_v62  ;;  %v1333_v31 = vmul.f32 %v1875_v28, %v1309_v63  ;;  %v1335_v32 = vmul.f32 %v1875_v28, %v1311_v1 }
 0x38e   : > { %v1362_v33 = vmul.f32 %v1353_v9, %v1334_v29  ;;  %v1360_v34 = vmul.f32 %v1343_v21, %v1332_v30  ;;  %v1361_v35 = vmul.f32 %v1348_v22, %v1333_v31  ;;  %v1363_v36 = vmul.f32 %v1358_v27, %v1335_v32 }
 0x390   : > { %v1388_v39 = vadd.f32 %v1371_v25, %v1360_v34  ;;  %v1389_v40 = vadd.f32 %v1376_v26, %v1361_v35  ;;  %v1390_v41 = vadd.f32 %v1381_v37, %v1362_v33  ;;  %v1391_v42 = vadd.f32 %v1386_v38, %v1363_v36 }
 0x392   : > { %v1781_v43 = vpack.c.bf16 %v1389_v40, %v1388_v39  ;;  %v1784_v44 = vpack.c.bf16 %v1391_v42, %v1390_v41 }
 0x394   : > { %1782 = vmatpush3.bf16.msra.mxu1 %v1781_v43 }
 0x395   : > { %1783 = vmatprep.subr.bf16.mxu1 %v1956_v8 }
 0x398   : > { %1785 = vmatpush3.bf16.msra.mxu1 %v1784_v44 }
 0x39b   : > { %1756 = vmatmul.mubr.msk.f32.vlgmr.msra.gmra.mrb[6].mxu1 %vm797_vm7, %v1392_v45 }
 0x46e   : > { %v1468_v47 = vpop.f32.mrb[6].mxu1 }
 0x46f   : > { %v1469_v48 = vadd.f32 %v1468_v47, %v1397_v46  ;;  %v1757_v49 = vpop.f32.mrb[7].mxu1 }
 0x471   : > { %v1478_v51 = vmul.f32 %v1476_v50, %v1469_v48 }
 0x473   : > { %v1480_v52 = vsel %vm1479_vm3, %v1478_v51, 0.0 }
 0x474   : > { %v1481_v53 = vrot.slane %v1480_v52, 4 }
 0x476   : > { %v1482_v8 = vadd.f32 %v1481_v53, %v1480_v52 }
 0x478   : > { %v1483_v54 = vrot.slane %v1482_v8, 2 }
 0x47a   : > { %v1484_v55 = vadd.f32 %v1483_v54, %v1482_v8 }
 0x47c   : > { %v1485_v56 = vrot.slane %v1484_v55, 1 }
 0x47e   : > { %v1486_v57 = vadd.f32 %v1485_v56, %v1484_v55 }
 0x480   : > { %1488 = vst.msk [vmem:[%s618_s24] sm:$0x1] %vm1487_vm4, %v1486_v57 }
 0x481   : > { %1889 = shalt.err (!%p1886_p5)
}
 0x482   : > { %s1890_s1 = scalar_lea.hbm %s2301_s4, 16  ;;  %s1894_s29 = scalar_lea.hbm %s2365_s17, 32 }
 0x483   : > { %p1891_p6 = scmp.ne.s32.totalorder %s2301_s4, %s1890_s1  ;;  %p1895_p10 = scmp.lt.u32.totalorder %s2301_s4, %s2365_s17 }
 0x484   : > { %p1896_p11 = scmp.lt.u32.totalorder %s1894_s29, %s1890_s1  ;;  %p1898_p13 = scmp.lt.u32.totalorder %s1890_s1, %s2301_s4 }
 0x485   : > { %p1892_p7 = pnand %p1891_p6, %p2096_p4 }
 0x486   : > { %p1897_p12 = por %p1896_p11, %p1895_p10 }
 0x487   : > { %p1893_p9 = pneg %p1892_p7 }
 0x488   : > { %p1899_p0 = por %p1898_p13, %p1897_p12 }
 0x48a   : > { %p1900_p1 = pnand %p1899_p0, %p1893_p9 }
 0x48c   : > { %1903 = shalt.err (!%p1900_p1)
}
 0x48d   : > { %1787 = dma.vmem_to_hbm [thread:$0]  (%p2096_p4), %s2303_s25, 16, %s2301_s4, %s1490_s20  }
 0x48e PF: > { %p1793_p2 = scmp.ge.s32.totalorder %s1954_s19, 2  ;;  %s1522_s23 = sand.u32 1, %s1934_s27  }
 0x48f   : > { %s1523_s30 = scalar_lea.sflag [#allocation4], %s1522_s23 }
 0x490   : > { %p1790_p3 = pnand %p1793_p2, %p2103_p8 }
 0x492   : > { %1929 = dma.done.wait (!%p1790_p3), %s1523_s30, 16  }
 0x493   : > { %1931 = vsyncadd (!%p1790_p3), %s1523_s30, 4294967280  ;;  %s32_s19 = sadd.s32 1, %s1954_s19   ;;  %s2391_s22 = sld [smem:[#allocation6_spill]] }
 0x494   : > { %p29_p5 = scmp.ge.s32.totalorder %s32_s19, 4   ;;  %s2392_s29 = sld [smem:[#allocation10_spill]] }
 0x495   : > { %s2393_s30 = sld [smem:[#allocation7_spill]]  ;;  %s2394_s0 = sld [smem:[#allocation8_spill]] }
 0x496   : > { %s2395_s27 = smov %s1938_s28  ;;  %31 = sbr.rel (!%p29_p5) target bundleno = 11 (0xb), region = 145 }
 0x499   : > { %s2396_s28 = smov %s2391_s22 }
 0x49d   :  { %1534 = vsyncpa [#allocation4], 1 }
 0x49e   :  { %1536 = vsyncpa [#allocation4 + $0x1], 1 }

</bundles_post_ra>
